<compile_context>
chip_gen: v7x
topology: tpu7x:2x2x1
jax: 0.10.0
libtpu: 0.0.40
codegen_flags: <defaults>
</compile_context>

<pallas_src>
import numpy as np
import jax
import jax.numpy as jnp
from jax.experimental import pallas as pl
from jax.experimental.pallas import tpu as pltpu


# ----------------------------------------------------------------------------- 
# PE table construction (matches the PyTorch __init__ exactly, built with numpy)
# -----------------------------------------------------------------------------
def _sinusoidal_pe(d_model: int, max_len: int) -> np.ndarray:
    position = np.arange(0, max_len, dtype=np.float32)[:, None]
    div_term = np.exp(np.arange(0, d_model, 2, dtype=np.float32)
                      * (-np.log(10000.0) / d_model))
    pe = np.zeros((max_len, d_model), dtype=np.float32)
    pe[:, 0::2] = np.sin(position * div_term)
    pe[:, 1::2] = np.cos(position * div_term)
    return pe


# -----------------------------------------------------------------------------
# Kernel: rank-matched sublane-broadcast add on the VPU (no relayout).
# -----------------------------------------------------------------------------
def _pe_add_kernel(x_ref, pe_ref, o_ref):
    # x_ref: (TB, TC), pe_ref: (1, TC)
    o_ref[...] = x_ref[...] + pe_ref[...]


# -----------------------------------------------------------------------------
# Tile selection
# -----------------------------------------------------------------------------
_MIN_STEPS = 8              # enough steps for DMA/compute overlap + v7x 2-TC split
_MIN_TILE_BYTES = 512 * 1024


def _default_target_elems(itemsize: int) -> int:
    """~2 MiB of x per grid step by default; ~4 MiB on v7x-class chips
    (64 MiB VMEM / ~3.2 TB/s HBM) where the fixed per-step cost would otherwise
    be a 15-25% tax at 2 MiB tiles."""
    target_bytes = 2 * 1024 * 1024
    try:
        info = pltpu.get_tpu_info()
        vmem = getattr(info, "vmem_capacity_bytes", None)
        if vmem is not None and vmem <= 80 * 1024 * 1024:   # v7x-class (64 MiB/TC)
            target_bytes = 4 * 1024 * 1024
    except Exception:
        pass
    return max(8 * 128, target_bytes // itemsize)


def _col_options(n_cols: int):
    """Divisors of n_cols that are multiples of 128, descending (n_cols % 128 == 0)."""
    return sorted({t for t in range(128, n_cols + 1, 128) if n_cols % t == 0},
                  reverse=True)


def _row_options(n_rows: int, sub: int):
    """n_rows itself plus divisors of n_rows that are multiples of sub, descending."""
    opts = {n_rows}
    for t in range(sub, n_rows, sub):
        if n_rows % t == 0:
            opts.add(t)
    return sorted(opts, reverse=True)


def _choose_tiles(n_rows: int, n_cols: int, itemsize: int, target_elems: int):
    sub = max(8, (4 // itemsize) * 8)        # 8 for 32-bit, 16 for 16-bit dtypes
    cols = _col_options(n_cols)
    rows = _row_options(n_rows, sub)

    tc = next((t for t in cols if t <= max(128, target_elems // sub)), cols[-1])
    tb = next((t for t in rows if t <= max(1, target_elems // tc)), rows[-1])

    def n_steps(tb_, tc_):
        return (n_cols // tc_) * (n_rows // tb_)

    # Guarantee a multi-step grid (pipelining + TensorCore split) while each
    # x tile stays >= _MIN_TILE_BYTES. Shrink rows first (keeps wide lane-dense
    # columns and maximizes pe-tile reuse across the inner row axis).
    while n_steps(tb, tc) < _MIN_STEPS:
        nxt_tb = next((t for t in rows
                       if t < tb and t * tc * itemsize >= _MIN_TILE_BYTES), None)
        if nxt_tb is not None:
            tb = nxt_tb
            continue
        nxt_tc = next((t for t in cols
                       if t < tc and tb * t * itemsize >= _MIN_TILE_BYTES), None)
        if nxt_tc is not None:
            tc = nxt_tc
            continue
        break
    return tb, tc


# -----------------------------------------------------------------------------
# Forward
# -----------------------------------------------------------------------------
def positional_encoding_forward(x: jnp.ndarray, pe_flat: jnp.ndarray,
                                *, target_block_elems: int | None = None) -> jnp.ndarray:
    """x: (B, S, D); pe_flat: (1, max_len*D), ideally already in x.dtype.
    Returns x + pe[:, :S] (pe broadcast over the batch)."""
    B, S, D = x.shape
    N = S * D
    if N > pe_flat.shape[1]:
        raise ValueError(f"S*D = {N} exceeds flattened pe length {pe_flat.shape[1]}")
    if pe_flat.dtype != x.dtype:
        # Fallback only; prefer constructing pe in the target dtype once (see class).
        pe_flat = pe_flat.astype(x.dtype)

    itemsize = jnp.dtype(x.dtype).itemsize
    if target_block_elems is None:
        target_block_elems = _default_target_elems(itemsize)

    x2 = x.reshape(B, N)
    pad = (-N) % 128
    if pad:
        # Non-128-aligned S*D: pad columns once so normal lane-aligned tiling
        # applies (bounded tiles, unmasked stores); slice the output afterwards.
        n_cols = N + pad
        x2 = jnp.pad(x2, ((0, 0), (0, pad)))
        pe_use = jnp.pad(pe_flat[:, :N], ((0, 0), (0, pad)))
    else:
        n_cols = N
        pe_use = pe_flat   # ":S" window selected purely via the index_map (no per-call op)

    tb, tc = _choose_tiles(B, n_cols, itemsize, target_block_elems)
    grid = (n_cols // tc, B // tb)   # columns outermost -> pe tile reused across inner steps

    # Explicit VMEM budget: double-buffered x-in + x-out tiles + pe tiles, with
    # 2x headroom, clamped to [16 MiB, 48 MiB] so it is valid on every generation.
    tile_bytes = tb * tc * itemsize
    needed = 2 * 2 * tile_bytes + 2 * tc * itemsize
    vmem_limit = int(min(max(2 * needed, 16 * 1024 * 1024), 48 * 1024 * 1024))

    grid_spec = pltpu.PrefetchScalarGridSpec(
        num_scalar_prefetch=0,
        grid=grid,
        in_specs=[
            pl.BlockSpec((tb, tc), lambda j, i: (i, j)),   # x tile
            pl.BlockSpec((1, tc), lambda j, i: (0, j)),    # shared pe row (batch-broadcast)
        ],
        out_specs=pl.BlockSpec((tb, tc), lambda j, i: (i, j)),
    )

    out2 = pl.pallas_call(
        _pe_add_kernel,
        out_shape=jax.ShapeDtypeStruct((B, n_cols), x.dtype),
        grid_spec=grid_spec,
        compiler_params=pltpu.CompilerParams(
            dimension_semantics=("parallel", "parallel"),
            vmem_limit_bytes=vmem_limit,
        ),
    )(x2, pe_use)

    if pad:
        out2 = out2[:, :N]
    return out2.reshape(B, S, D)


class PositionalEncoding:
    """JAX/Pallas port of the PyTorch module: forward(x) = x + pe[:, :x.shape[1]]."""

    def __init__(self, d_model: int, max_len: int = 500, dtype=jnp.float32):
        self.d_model = d_model
        self.max_len = max_len
        pe = _sinusoidal_pe(d_model, max_len)
        # Reference-form buffer (f32) and the kernel-form buffer: precomputed ONCE,
        # pre-flattened and already in the target dtype (no per-call cast/slice).
        # Note: for bf16/fp16 inputs pe is rounded to the input dtype before the
        # add (slightly different from PyTorch's f32-promoted add); pass
        # dtype=jnp.float32 inputs for tolerance-sensitive use.
        self.pe = jnp.asarray(pe[None, :, :], dtype=jnp.float32)        # (1, max_len, D)
        self.pe_flat = jnp.asarray(pe.reshape(1, -1), dtype=dtype)      # (1, max_len*D)

    def __call__(self, x: jnp.ndarray, *, target_block_elems: int | None = None) -> jnp.ndarray:
        if x.shape[-1] != self.d_model:
            raise ValueError(f"d_model mismatch: x has {x.shape[-1]}, pe has {self.d_model}")
        if x.shape[1] > self.max_len:
            raise ValueError(f"sequence length {x.shape[1]} exceeds max_len {self.max_len}")
        return positional_encoding_forward(x, self.pe_flat,
                                           target_block_elems=target_block_elems)


if __name__ == "__main__":
    key = jax.random.PRNGKey(0)
    k1, k2, k3 = jax.random.split(key, 3)
    max_len = 500

    # 1) Small shape consistent with the module (single lane-dense block, grid (1,1)).
    B, S, D = 2, 8, 32
    mod = PositionalEncoding(D, max_len)
    x = jax.random.normal(k1, (B, S, D), dtype=jnp.float32)
    out = jax.block_until_ready(mod(x))
    ref = x + mod.pe[:, :S, :]
    np.testing.assert_allclose(np.asarray(out), np.asarray(ref), rtol=1e-6, atol=1e-6)

    # 2) Non-128-aligned S*D -> exercises the zero-pad + output-slice path.
    B2, S2, D2 = 3, 7, 20
    mod2 = PositionalEncoding(D2, max_len)
    x2 = jax.random.normal(k2, (B2, S2, D2), dtype=jnp.float32)
    out2 = jax.block_until_ready(mod2(x2))
    ref2 = x2 + mod2.pe[:, :S2, :]
    np.testing.assert_allclose(np.asarray(out2), np.asarray(ref2), rtol=1e-6, atol=1e-6)

    # 3) Force a multi-tile grid (8 column tiles x 2 row tiles = 16 steps) to
    #    exercise the index_map windowing of pe plus row/column tiling.
    B3, S3, D3 = 16, 16, 64
    mod3 = PositionalEncoding(D3, max_len)
    x3 = jax.random.normal(k3, (B3, S3, D3), dtype=jnp.float32)
    out3 = jax.block_until_ready(mod3(x3, target_block_elems=1024))
    ref3 = x3 + mod3.pe[:, :S3, :]
    np.testing.assert_allclose(np.asarray(out3), np.asarray(ref3), rtol=1e-6, atol=1e-6)

    print("KERNEL_OK")
</pallas_src>

<mosaic_0001>
module attributes {stable_mosaic.version = 11 : i64} {
  func.func @_pe_add_kernel(%arg0: i32, %arg1: i32, %arg2: memref<2x256xf32, #tpu.memory_space<vmem>>, %arg3: memref<1x256xf32, #tpu.memory_space<vmem>>, %arg4: memref<2x256xf32, #tpu.memory_space<vmem>>) attributes {dimension_semantics = [#tpu.dimension_semantics<parallel>, #tpu.dimension_semantics<parallel>], iteration_bounds = array<i64: 1, 1>, scalar_prefetch = 0 : i64, scratch_operands = 0 : i64, tpu.core_type = #tpu.core_type<tc>, window_params = [{transform_indices = @transform_0, window_bounds = array<i64: 2, 256>}, {transform_indices = @transform_1, window_bounds = array<i64: 1, 256>}, {transform_indices = @transform_2, window_bounds = array<i64: 2, 256>}]} {
    %c0 = arith.constant 0 : index
    %c0_0 = arith.constant 0 : index
    %0 = vector.load %arg2[%c0, %c0_0] : memref<2x256xf32, #tpu.memory_space<vmem>>, vector<2x256xf32>
    %c0_1 = arith.constant 0 : index
    %c0_2 = arith.constant 0 : index
    %1 = vector.load %arg3[%c0_1, %c0_2] : memref<1x256xf32, #tpu.memory_space<vmem>>, vector<1x256xf32>
    %2 = vector.broadcast %1 : vector<1x256xf32> to vector<2x256xf32>
    %3 = arith.addf %0, %2 : vector<2x256xf32>
    %c0_3 = arith.constant 0 : index
    %c0_4 = arith.constant 0 : index
    %4 = vector.load %arg4[%c0_3, %c0_4] : memref<2x256xf32, #tpu.memory_space<vmem>>, vector<2x256xf32>
    tpu.vector_store %arg4[%c0_3, %c0_4], %3 {strides = array<i32>} : memref<2x256xf32, #tpu.memory_space<vmem>>, vector<2x256xf32>,
    return
  }
  func.func @transform_0(%arg0: i32, %arg1: i32) -> (i32, i32) {
    %c0_i32 = arith.constant 0 : i32
    return %arg1, %arg0 : i32, i32
  }
  func.func @transform_1(%arg0: i32, %arg1: i32) -> (i32, i32) {
    %c0_i32 = arith.constant 0 : i32
    %c0_i32_0 = arith.constant 0 : i32
    return %c0_i32, %arg0 : i32, i32
  }
  func.func @transform_2(%arg0: i32, %arg1: i32) -> (i32, i32) {
    %c0_i32 = arith.constant 0 : i32
    return %arg1, %arg0 : i32, i32
  }
}

</mosaic_0001>

<bundles_post_ra>
// kernel: tpu_custom_call.1
= control target key start
LH: loop header
LB: loop body
LE: loop exit
PB: predicated region body
PF: predicated region fallthrough
CT: control target
= control target key end

     0   :  { %7 = vsyncpa [#allocation3], 0  ;;  %s215_s0 = inlined_call_operand.hbm [shape: f32[2,256], index: 0, kind: input, shape index: {}]   ;;  %s216_s1 = inlined_call_operand.hbm [shape: f32[1,16000], index: 1, kind: input, shape index: {}]   ;;  %s217_s2 = inlined_call_operand.hbm [shape: f32[2,256], index: 2, kind: output, shape index: {}]  }
   0x1   :  { %8 = vsyncpa [#allocation6], 0 }
   0x2   :  { %9 = vsyncpa [#allocation4], 0  ;;  %s150_s9 = smov [#allocation2]   ;;  %s151_s11 = smov [#allocation5]  }
   0x3   :  { %s16_s10 = sshll.u32 %s150_s9, 4  ;;  %s26_s12 = sshll.u32 %s151_s11, 4  ;;  %s17_s10 = int_to_ptr.vmem [resolvable:$true] %s16_s10  ;;  %s169_s12 = int_to_ptr.vmem [resolvable:$true] %s26_s12 }
   0x4   :  { %s78_s15 = scalar_lea.hbm %s215_s0, 64 }
   0x5   :  { %p79_p0 = scmp.ne.s32.totalorder %s215_s0, %s78_s15  ;;  %p82_p1 = scmp.lt.u32.totalorder %s78_s15, %s215_s0 }
   0x7   :  { %p84_p2 = pnand %p82_p1, %p79_p0 }
   0x9   :  { %87 = shalt.err (!%p84_p2)
}
   0xa   :  { %s88_s20 = scalar_lea.vmem %s17_s10, 64  ;;  %p93_p4 = scmp.lt.s32.totalorder %s17_s10, %s17_s10 }
   0xb   :  { %p89_p3 = scmp.ne.s32.totalorder %s17_s10, %s88_s20  ;;  %p94_p5 = scmp.lt.s32.totalorder %s88_s20, %s88_s20 }
   0xd   :  { %p95_p6 = por %p94_p5, %p93_p4 }
   0xf   :  { %p96_p7 = pnand %p95_p6, %p89_p3 }
  0x11   :  { %99 = shalt.err (!%p96_p7)
}
  0x12   :  { %19 = dma.hbm_to_vmem [thread:$0]  %s215_s0, 64, %s17_s10, [#allocation3]  }
  0x13   :  { %s100_s25 = scalar_lea.hbm %s216_s1, 32  ;;  %s102_s30 = scalar_lea.hbm %s216_s1, 2000 }
  0x14   :  { %p101_p8 = scmp.ne.s32.totalorder %s216_s1, %s100_s25  ;;  %p103_p9 = scmp.lt.u32.totalorder %s102_s30, %s100_s25 }
  0x15   :  { %p104_p10 = scmp.lt.u32.totalorder %s100_s25, %s216_s1 }
  0x17   :  { %p105_p11 = por %p104_p10, %p103_p9 }
  0x19   :  { %p106_p12 = pnand %p105_p11, %p101_p8 }
  0x1b   :  { %109 = shalt.err (!%p106_p12)
}
  0x1c   :  { %s110_s0 = scalar_lea.vmem %s169_s12, 32  ;;  %p115_p0 = scmp.lt.s32.totalorder %s169_s12, %s169_s12 }
  0x1d   :  { %p111_p13 = scmp.ne.s32.totalorder %s169_s12, %s110_s0  ;;  %p116_p1 = scmp.lt.s32.totalorder %s110_s0, %s110_s0 }
  0x1f   :  { %p117_p2 = por %p116_p1, %p115_p0 }
  0x21   :  { %p118_p3 = pnand %p117_p2, %p111_p13 }
  0x23   :  { %121 = shalt.err (!%p118_p3)
}
  0x24   :  { %29 = dma.hbm_to_vmem [thread:$0]  %s216_s1, 32, %s169_s12, [#allocation6]  }
  0x25   :  { %144 = dma.done.wait [#allocation3], 64  }
  0x26   :  { %145 = vsyncadd [#allocation3], 4294967232 }
  0x27   :  { %146 = dma.done.wait [#allocation6], 32  }
  0x28   :  { %147 = vsyncadd [#allocation6], 4294967264  ;;  %v39_v0 = vlaneseq  ;;  %v152_v1 = vmov 1983009808   ;;  %v37_v7 = vld [vmem:[#allocation5] sm:$0x3] }
  0x29   :  { %v49_v2 = vunpack.c.l.s4 %v152_v1  ;;  %v36_v12 = vld [vmem:[#allocation2] sm:$0xf]  ;;  %s153_s7 = smov [#allocation7]  }
  0x2a   :  { %v40_v3 = vshrl.u32 %v39_v0, 7  ;;  %s64_s8 = sshll.u32 %s153_s7, 4  ;;  %s65_s8 = int_to_ptr.vmem [resolvable:$true] %s64_s8 }
  0x2b   :  { %v50_v6 = vunpack.c.0.s8 %v49_v2  ;;  %s122_s1 = scalar_lea.vmem %s65_s8, 64  ;;  %p127_p5 = scmp.lt.s32.totalorder %s65_s8, %s65_s8 }
  0x2c   :  { %v41_v4 = vsub.s32 0, %v40_v3  ;;  %v45_v5 = vsub.s32 1, %v40_v3  ;;  %p123_p4 = scmp.ne.s32.totalorder %s65_s8, %s122_s1  ;;  %p128_p6 = scmp.lt.s32.totalorder %s122_s1, %s122_s1 }
  0x2d   :  { %v53_v10 = vsub.s32 %v50_v6, %v40_v3 }
  0x2e   :  { %v42_v8 = vrot.slane %v37_v7, %v41_v4  ;;  %v46_v9 = vrot.slane %v37_v7, %v45_v5  ;;  %p129_p7 = por %p128_p6, %p127_p5 }
  0x30   :  { %v47_v11 = vcombine.low %v42_v8, %v46_v9  ;;  %p130_p8 = pnand %p129_p7, %p123_p4 }
  0x32   :  { %v54_v13 = vrot.slane %v47_v11, %v53_v10 }
  0x34   :  { %v56_v14 = vadd.f32 %v54_v13, %v36_v12 }
  0x36   :  { %57 = vst [vmem:[#allocation7] sm:$0xf] %v56_v14 }
  0x37   :  { %133 = shalt.err (!%p130_p8)
}
  0x38   :  { %s134_s11 = scalar_lea.hbm %s217_s2, 64 }
  0x39   :  { %p135_p9 = scmp.ne.s32.totalorder %s217_s2, %s134_s11  ;;  %p138_p10 = scmp.lt.u32.totalorder %s134_s11, %s217_s2 }
  0x3b   :  { %p140_p11 = pnand %p138_p10, %p135_p9 }
  0x3d   :  { %143 = shalt.err (!%p140_p11)
}
  0x3e   :  { %67 = dma.vmem_to_hbm [thread:$0]  %s65_s8, 64, %s217_s2, [#allocation4]  }
  0x3f   :  { %148 = dma.done.wait [#allocation4], 64  }
  0x40   :  { %149 = vsyncadd [#allocation4], 4294967232 }
  0x41   :  { %71 = vsyncpa [#allocation3], 1 }
  0x42   :  { %72 = vsyncpa [#allocation6], 1 }
  0x43   :  { %73 = vsyncpa [#allocation4], 1 }

</bundles_post_ra>
